<compile_context>
chip_gen: v5e
topology: v5e:2x2
jax: 0.10.0
libtpu: 0.0.40
codegen_flags: <defaults>
</compile_context>

<pallas_src>
import functools

import jax
import jax.numpy as jnp
from jax.experimental import pallas as pl
from jax.experimental.pallas import tpu as pltpu

EPS = 1e-5
LANES = 128     # last-dim (lane) granularity
SUBLANES = 8    # second-to-last (sublane) granularity for f32


def _round_up(n, m):
    return ((n + m - 1) // m) * m


def _pad2d(a, rows, cols):
    return jnp.pad(a, ((0, rows - a.shape[0]), (0, cols - a.shape[1])))


# ---------------------------------------------------------------------------
# Kernel
# ---------------------------------------------------------------------------
def encoder_kernel(
    x_ref,
    w1_ref, b1_ref, g1_ref, beta1_ref,
    w2_ref, b2_ref, g2_ref, beta2_ref,
    w3_ref, b3_ref,
    out_ref,
    *, valid_rows,
):
    bp = x_ref.shape[0]
    inv_n = jnp.float32(1.0 / valid_rows)

    # Row mask only needed if the batch was padded (padded rows excluded from BN stats).
    if bp > valid_rows:
        row_ids = jax.lax.broadcasted_iota(jnp.int32, (bp, 1), 0)
        row_mask = (row_ids < valid_rows).astype(jnp.float32)
    else:
        row_mask = None

    # Hoist small per-channel params (loaded once, reused).
    b1 = b1_ref[...]
    g1 = g1_ref[...]
    be1 = beta1_ref[...]
    b2 = b2_ref[...]
    g2 = g2_ref[...]
    be2 = beta2_ref[...]
    b3 = b3_ref[...]

    def bn_relu(h, gamma, beta):
        hm = h if row_mask is None else h * row_mask
        # Single pass: accumulate sum and sum-of-squares together.
        s = jnp.sum(hm, axis=0, keepdims=True)
        sq = jnp.sum(hm * hm, axis=0, keepdims=True)
        mu = s * inv_n
        var = jnp.maximum(sq * inv_n - mu * mu, 0.0)   # biased variance (PyTorch BN fwd)
        hhat = (h - mu) * jax.lax.rsqrt(var + EPS)
        return jnp.maximum(hhat * gamma + beta, 0.0)

    # ---- Layer 1: Linear + BN + ReLU ----
    h = jnp.dot(x_ref[...], w1_ref[...], preferred_element_type=jnp.float32) + b1
    h = bn_relu(h, g1, be1)

    # ---- Layer 2: Linear + BN + ReLU ----
    h = jnp.dot(h.astype(jnp.bfloat16), w2_ref[...],
                preferred_element_type=jnp.float32) + b2
    h = bn_relu(h, g2, be2)

    # ---- Layer 3: final Linear to bottleneck ----
    out = jnp.dot(h.astype(jnp.bfloat16), w3_ref[...],
                  preferred_element_type=jnp.float32) + b3
    out_ref[...] = out.astype(out_ref.dtype)


# ---------------------------------------------------------------------------
# Params (real shapes, PyTorch-equivalent) + lane-padded / bf16 device params
# ---------------------------------------------------------------------------
def init_params(key, in_dim, h_dim_list, bottleneck_dim):
    """Synthetic init matching the PyTorch module's parameter shapes.

    Linear i: weight [dims[i], dims[i+1]] (transposed vs. PyTorch [out,in]), bias [1, dims[i+1]].
    BatchNorm1d i (hidden layers only): gamma=1, beta=0 (PyTorch default init).
    """
    dims = [in_dim] + list(h_dim_list) + [bottleneck_dim]
    keys = jax.random.split(key, 2 * (len(dims) - 1))
    params = {}
    for i in range(len(dims) - 1):
        bound = 1.0 / jnp.sqrt(dims[i])
        params[f"w{i + 1}"] = jax.random.uniform(
            keys[2 * i], (dims[i], dims[i + 1]),
            minval=-bound, maxval=bound, dtype=jnp.float32)
        params[f"b{i + 1}"] = jax.random.uniform(
            keys[2 * i + 1], (1, dims[i + 1]),
            minval=-bound, maxval=bound, dtype=jnp.float32)
        if i < len(dims) - 2:
            params[f"g{i + 1}"] = jnp.ones((1, dims[i + 1]), jnp.float32)
            params[f"beta{i + 1}"] = jnp.zeros((1, dims[i + 1]), jnp.float32)
    return params


def prepare_padded_params(params, in_dim, h_dim_list, bottleneck_dim):
    """Pad all feature dims to 128-lane multiples (zeros); weights stored as bf16."""
    dims = [in_dim] + list(h_dim_list) + [bottleneck_dim]
    pdims = [_round_up(d, LANES) for d in dims]
    padded = {}
    n = len(dims) - 1
    for i in range(n):
        padded[f"w{i + 1}"] = _pad2d(params[f"w{i + 1}"], pdims[i], pdims[i + 1]).astype(jnp.bfloat16)
        padded[f"b{i + 1}"] = _pad2d(params[f"b{i + 1}"], 1, pdims[i + 1])
        if i < n - 1:
            padded[f"g{i + 1}"] = _pad2d(params[f"g{i + 1}"], 1, pdims[i + 1])
            padded[f"beta{i + 1}"] = _pad2d(params[f"beta{i + 1}"], 1, pdims[i + 1])
    return padded, pdims


# ---------------------------------------------------------------------------
# Wrapper
# ---------------------------------------------------------------------------
def encoder_forward(x, padded_params, pdims, in_dim, bottleneck_dim):
    """x: [B, in_dim] float32 -> [B, bottleneck_dim] float32."""
    B = x.shape[0]
    Bp = _round_up(B, SUBLANES)
    out_pad = pdims[-1]

    # Lane-pad the input and cast activations to bf16 (halves activation DMA bytes).
    x_p = _pad2d(x, Bp, pdims[0]).astype(jnp.bfloat16)

    inputs = [
        x_p,
        padded_params["w1"], padded_params["b1"], padded_params["g1"], padded_params["beta1"],
        padded_params["w2"], padded_params["b2"], padded_params["g2"], padded_params["beta2"],
        padded_params["w3"], padded_params["b3"],
    ]

    def full_spec(a):
        # whole-array block, single grid point
        return pl.BlockSpec(a.shape, lambda: tuple(0 for _ in a.shape))

    flops = 2 * Bp * (pdims[0] * pdims[1] + pdims[1] * pdims[2] + pdims[2] * pdims[3])
    transcendentals = pdims[1] + pdims[2]  # one rsqrt per BN channel
    bytes_accessed = sum(int(a.size) * a.dtype.itemsize for a in inputs) + Bp * out_pad * 4

    out_p = pl.pallas_call(
        functools.partial(encoder_kernel, valid_rows=B),
        out_shape=jax.ShapeDtypeStruct((Bp, out_pad), jnp.float32),
        grid=(),
        in_specs=[full_spec(a) for a in inputs],
        out_specs=pl.BlockSpec((Bp, out_pad), lambda: (0, 0)),
        compiler_params=pltpu.CompilerParams(vmem_limit_bytes=32 << 20),
        cost_estimate=pl.CostEstimate(
            flops=flops, transcendentals=transcendentals, bytes_accessed=bytes_accessed),
    )(*inputs)

    return out_p[:B, :bottleneck_dim]


# ---------------------------------------------------------------------------
# Pure-JAX reference (same bf16-input / f32-accum matmul math as the kernel)
# ---------------------------------------------------------------------------
def encoder_reference(x, params):
    def mm(a, w):
        return jnp.dot(a.astype(jnp.bfloat16), w.astype(jnp.bfloat16),
                       preferred_element_type=jnp.float32)

    h = mm(x, params["w1"]) + params["b1"]
    mu = h.mean(0, keepdims=True)
    var = ((h - mu) ** 2).mean(0, keepdims=True)
    h = (h - mu) / jnp.sqrt(var + EPS) * params["g1"] + params["beta1"]
    h = jnp.maximum(h, 0.0)

    h = mm(h, params["w2"]) + params["b2"]
    mu = h.mean(0, keepdims=True)
    var = ((h - mu) ** 2).mean(0, keepdims=True)
    h = (h - mu) / jnp.sqrt(var + EPS) * params["g2"] + params["beta2"]
    h = jnp.maximum(h, 0.0)

    return mm(h, params["w3"]) + params["b3"]


if __name__ == "__main__":
    # Small shapes implied by the module: flat feature vectors through an MLP.
    B, in_dim = 8, 32
    h_dim_list = [64, 32]
    bottleneck_dim = 16

    key = jax.random.PRNGKey(0)
    kx, kp = jax.random.split(key)
    x = jax.random.normal(kx, (B, in_dim), dtype=jnp.float32)

    params = init_params(kp, in_dim, h_dim_list, bottleneck_dim)
    padded_params, pdims = prepare_padded_params(params, in_dim, h_dim_list, bottleneck_dim)

    out = encoder_forward(x, padded_params, pdims, in_dim, bottleneck_dim)
    out = jax.block_until_ready(out)

    ref = encoder_reference(x, params)
    assert out.shape == (B, bottleneck_dim)
    assert jnp.allclose(out, ref, atol=1e-2, rtol=1e-2), "mismatch vs. reference"

    print("KERNEL_OK")
</pallas_src>

<mosaic_0001>
module attributes {stable_mosaic.version = 11 : i64} {
  func.func @encoder_kernel(%arg0: memref<8x128xbf16, #tpu.memory_space<vmem>>, %arg1: memref<128x128xbf16, #tpu.memory_space<vmem>>, %arg2: memref<1x128xf32, #tpu.memory_space<vmem>>, %arg3: memref<1x128xf32, #tpu.memory_space<vmem>>, %arg4: memref<1x128xf32, #tpu.memory_space<vmem>>, %arg5: memref<128x128xbf16, #tpu.memory_space<vmem>>, %arg6: memref<1x128xf32, #tpu.memory_space<vmem>>, %arg7: memref<1x128xf32, #tpu.memory_space<vmem>>, %arg8: memref<1x128xf32, #tpu.memory_space<vmem>>, %arg9: memref<128x128xbf16, #tpu.memory_space<vmem>>, %arg10: memref<1x128xf32, #tpu.memory_space<vmem>>, %arg11: memref<8x128xf32, #tpu.memory_space<vmem>>) attributes {dimension_semantics = [], scalar_prefetch = 0 : i64, scratch_operands = 0 : i64, tpu.core_type = #tpu.core_type<tc>} {
    %c0 = arith.constant 0 : index
    %c0_0 = arith.constant 0 : index
    %0 = vector.load %arg2[%c0, %c0_0] : memref<1x128xf32, #tpu.memory_space<vmem>>, vector<1x128xf32>
    %c0_1 = arith.constant 0 : index
    %c0_2 = arith.constant 0 : index
    %1 = vector.load %arg3[%c0_1, %c0_2] : memref<1x128xf32, #tpu.memory_space<vmem>>, vector<1x128xf32>
    %c0_3 = arith.constant 0 : index
    %c0_4 = arith.constant 0 : index
    %2 = vector.load %arg4[%c0_3, %c0_4] : memref<1x128xf32, #tpu.memory_space<vmem>>, vector<1x128xf32>
    %c0_5 = arith.constant 0 : index
    %c0_6 = arith.constant 0 : index
    %3 = vector.load %arg6[%c0_5, %c0_6] : memref<1x128xf32, #tpu.memory_space<vmem>>, vector<1x128xf32>
    %c0_7 = arith.constant 0 : index
    %c0_8 = arith.constant 0 : index
    %4 = vector.load %arg7[%c0_7, %c0_8] : memref<1x128xf32, #tpu.memory_space<vmem>>, vector<1x128xf32>
    %c0_9 = arith.constant 0 : index
    %c0_10 = arith.constant 0 : index
    %5 = vector.load %arg8[%c0_9, %c0_10] : memref<1x128xf32, #tpu.memory_space<vmem>>, vector<1x128xf32>
    %c0_11 = arith.constant 0 : index
    %c0_12 = arith.constant 0 : index
    %6 = vector.load %arg10[%c0_11, %c0_12] : memref<1x128xf32, #tpu.memory_space<vmem>>, vector<1x128xf32>
    %c0_13 = arith.constant 0 : index
    %c0_14 = arith.constant 0 : index
    %7 = vector.load %arg0[%c0_13, %c0_14] : memref<8x128xbf16, #tpu.memory_space<vmem>>, vector<8x128xbf16>
    %c0_15 = arith.constant 0 : index
    %c0_16 = arith.constant 0 : index
    %8 = vector.load %arg1[%c0_15, %c0_16] : memref<128x128xbf16, #tpu.memory_space<vmem>>, vector<128x128xbf16>
    %cst = arith.constant dense<0.000000e+00> : vector<8x128xf32>
    %9 = tpu.matmul %7, %8, %cst {dimension_numbers = #tpu.dot_dimension_numbers<[1], [0], [0], [1], [0, 0, 1, 1], [], []>} : vector<8x128xbf16>, vector<128x128xbf16>, vector<8x128xf32> -> vector<8x128xf32>
    %10 = vector.broadcast %0 : vector<1x128xf32> to vector<8x128xf32>
    %11 = arith.addf %9, %10 : vector<8x128xf32>
    %cst_17 = arith.constant dense<0.000000e+00> : vector<128xf32>
    %12 = vector.multi_reduction <add>, %11, %cst_17 [0] : vector<8x128xf32> to vector<128xf32>
    %13 = vector.shape_cast %12 : vector<128xf32> to vector<1x128xf32>
    %14 = arith.mulf %11, %11 : vector<8x128xf32>
    %cst_18 = arith.constant dense<0.000000e+00> : vector<128xf32>
    %15 = vector.multi_reduction <add>, %14, %cst_18 [0] : vector<8x128xf32> to vector<128xf32>
    %16 = vector.shape_cast %15 : vector<128xf32> to vector<1x128xf32>
    %cst_19 = arith.constant 1.250000e-01 : f32
    %17 = vector.broadcast %cst_19 : f32 to vector<1x128xf32>
    %18 = arith.mulf %13, %17 : vector<1x128xf32>
    %cst_20 = arith.constant 1.250000e-01 : f32
    %19 = vector.broadcast %cst_20 : f32 to vector<1x128xf32>
    %20 = arith.mulf %16, %19 : vector<1x128xf32>
    %21 = arith.mulf %18, %18 : vector<1x128xf32>
    %22 = arith.subf %20, %21 : vector<1x128xf32>
    %cst_21 = arith.constant 0.000000e+00 : f32
    %23 = vector.broadcast %cst_21 : f32 to vector<1x128xf32>
    %24 = arith.maximumf %22, %23 : vector<1x128xf32>
    %25 = vector.broadcast %18 : vector<1x128xf32> to vector<8x128xf32>
    %26 = arith.subf %11, %25 : vector<8x128xf32>
    %cst_22 = arith.constant 9.99999974E-6 : f32
    %27 = vector.broadcast %cst_22 : f32 to vector<1x128xf32>
    %28 = arith.addf %24, %27 : vector<1x128xf32>
    %29 = math.rsqrt %28 : vector<1x128xf32>
    %30 = vector.broadcast %29 : vector<1x128xf32> to vector<8x128xf32>
    %31 = arith.mulf %26, %30 : vector<8x128xf32>
    %32 = vector.broadcast %1 : vector<1x128xf32> to vector<8x128xf32>
    %33 = arith.mulf %31, %32 : vector<8x128xf32>
    %34 = vector.broadcast %2 : vector<1x128xf32> to vector<8x128xf32>
    %35 = arith.addf %33, %34 : vector<8x128xf32>
    %cst_23 = arith.constant 0.000000e+00 : f32
    %36 = vector.broadcast %cst_23 : f32 to vector<8x128xf32>
    %37 = arith.maximumf %35, %36 : vector<8x128xf32>
    %38 = arith.truncf %37 : vector<8x128xf32> to vector<8x128xbf16>
    %c0_24 = arith.constant 0 : index
    %c0_25 = arith.constant 0 : index
    %39 = vector.load %arg5[%c0_24, %c0_25] : memref<128x128xbf16, #tpu.memory_space<vmem>>, vector<128x128xbf16>
    %cst_26 = arith.constant dense<0.000000e+00> : vector<8x128xf32>
    %40 = tpu.matmul %38, %39, %cst_26 {dimension_numbers = #tpu.dot_dimension_numbers<[1], [0], [0], [1], [0, 0, 1, 1], [], []>} : vector<8x128xbf16>, vector<128x128xbf16>, vector<8x128xf32> -> vector<8x128xf32>
    %41 = vector.broadcast %3 : vector<1x128xf32> to vector<8x128xf32>
    %42 = arith.addf %40, %41 : vector<8x128xf32>
    %cst_27 = arith.constant dense<0.000000e+00> : vector<128xf32>
    %43 = vector.multi_reduction <add>, %42, %cst_27 [0] : vector<8x128xf32> to vector<128xf32>
    %44 = vector.shape_cast %43 : vector<128xf32> to vector<1x128xf32>
    %45 = arith.mulf %42, %42 : vector<8x128xf32>
    %cst_28 = arith.constant dense<0.000000e+00> : vector<128xf32>
    %46 = vector.multi_reduction <add>, %45, %cst_28 [0] : vector<8x128xf32> to vector<128xf32>
    %47 = vector.shape_cast %46 : vector<128xf32> to vector<1x128xf32>
    %cst_29 = arith.constant 1.250000e-01 : f32
    %48 = vector.broadcast %cst_29 : f32 to vector<1x128xf32>
    %49 = arith.mulf %44, %48 : vector<1x128xf32>
    %cst_30 = arith.constant 1.250000e-01 : f32
    %50 = vector.broadcast %cst_30 : f32 to vector<1x128xf32>
    %51 = arith.mulf %47, %50 : vector<1x128xf32>
    %52 = arith.mulf %49, %49 : vector<1x128xf32>
    %53 = arith.subf %51, %52 : vector<1x128xf32>
    %cst_31 = arith.constant 0.000000e+00 : f32
    %54 = vector.broadcast %cst_31 : f32 to vector<1x128xf32>
    %55 = arith.maximumf %53, %54 : vector<1x128xf32>
    %56 = vector.broadcast %49 : vector<1x128xf32> to vector<8x128xf32>
    %57 = arith.subf %42, %56 : vector<8x128xf32>
    %cst_32 = arith.constant 9.99999974E-6 : f32
    %58 = vector.broadcast %cst_32 : f32 to vector<1x128xf32>
    %59 = arith.addf %55, %58 : vector<1x128xf32>
    %60 = math.rsqrt %59 : vector<1x128xf32>
    %61 = vector.broadcast %60 : vector<1x128xf32> to vector<8x128xf32>
    %62 = arith.mulf %57, %61 : vector<8x128xf32>
    %63 = vector.broadcast %4 : vector<1x128xf32> to vector<8x128xf32>
    %64 = arith.mulf %62, %63 : vector<8x128xf32>
    %65 = vector.broadcast %5 : vector<1x128xf32> to vector<8x128xf32>
    %66 = arith.addf %64, %65 : vector<8x128xf32>
    %cst_33 = arith.constant 0.000000e+00 : f32
    %67 = vector.broadcast %cst_33 : f32 to vector<8x128xf32>
    %68 = arith.maximumf %66, %67 : vector<8x128xf32>
    %69 = arith.truncf %68 : vector<8x128xf32> to vector<8x128xbf16>
    %c0_34 = arith.constant 0 : index
    %c0_35 = arith.constant 0 : index
    %70 = vector.load %arg9[%c0_34, %c0_35] : memref<128x128xbf16, #tpu.memory_space<vmem>>, vector<128x128xbf16>
    %cst_36 = arith.constant dense<0.000000e+00> : vector<8x128xf32>
    %71 = tpu.matmul %69, %70, %cst_36 {dimension_numbers = #tpu.dot_dimension_numbers<[1], [0], [0], [1], [0, 0, 1, 1], [], []>} : vector<8x128xbf16>, vector<128x128xbf16>, vector<8x128xf32> -> vector<8x128xf32>
    %72 = vector.broadcast %6 : vector<1x128xf32> to vector<8x128xf32>
    %73 = arith.addf %71, %72 : vector<8x128xf32>
    %c0_37 = arith.constant 0 : index
    %c0_38 = arith.constant 0 : index
    %74 = vector.load %arg11[%c0_37, %c0_38] : memref<8x128xf32, #tpu.memory_space<vmem>>, vector<8x128xf32>
    tpu.vector_store %arg11[%c0_37, %c0_38], %73 {strides = array<i32>} : memref<8x128xf32, #tpu.memory_space<vmem>>, vector<8x128xf32>,
    return
  }
}

</mosaic_0001>

<bundles_post_ra>
// kernel: tpu_custom_call.1
= control target key start
LH: loop header
LB: loop body
LE: loop exit
PB: predicated region body
PF: predicated region fallthrough
CT: control target
= control target key end

     0   :  { %16 = vsyncpa [#allocation3], 0  ;;  %s819_s0 = inlined_call_operand.hbm [shape: bf16[8,128], index: 0, kind: input, shape index: {}]   ;;  %s820_s1 = inlined_call_operand.hbm [shape: bf16[128,128], index: 1, kind: input, shape index: {}]   ;;  %s821_s2 = inlined_call_operand.vmem [shape: f32[1,128], index: 2, kind: input, shape index: {}]   ;;  %s822_s3 = inlined_call_operand.vmem [shape: f32[1,128], index: 3, kind: input, shape index: {}]   ;;  %s823_s4 = inlined_call_operand.vmem [shape: f32[1,128], index: 4, kind: input, shape index: {}]   ;;  %s824_s5 = inlined_call_operand.hbm [shape: bf16[128,128], index: 5, kind: input, shape index: {}]   ;;  %s825_s6 = inlined_call_operand.vmem [shape: f32[1,128], index: 6, kind: input, shape index: {}]   ;;  %s826_s7 = inlined_call_operand.vmem [shape: f32[1,128], index: 7, kind: input, shape index: {}]   ;;  %s827_s8 = inlined_call_operand.vmem [shape: f32[1,128], index: 8, kind: input, shape index: {}]   ;;  %s828_s9 = inlined_call_operand.hbm [shape: bf16[128,128], index: 9, kind: input, shape index: {}]   ;;  %s829_s10 = inlined_call_operand.vmem [shape: f32[1,128], index: 10, kind: input, shape index: {}]   ;;  %s830_s11 = inlined_call_operand.hbm [shape: f32[8,128], index: 11, kind: output, shape index: {}]  }
   0x1   :  { %17 = vsyncpa [#allocation6], 0 }
   0x2   :  { %18 = vsyncpa [#allocation9], 0  ;;  %s35_s19 = sshll.u32 %s820_s1, 4  ;;  %s36_s19 = int_to_ptr.hbm [resolvable:$true] %s35_s19 }
   0x3   :  { %19 = vsyncpa [#allocation4], 0  ;;  %s716_s20 = smov [#allocation5]   ;;  %s25_s24 = sshll.u32 %s819_s0, 4  ;;  %s26_s24 = int_to_ptr.hbm [resolvable:$true] %s25_s24 }
   0x4   :  { %s37_s21 = sshll.u32 %s716_s20, 4  ;;  %s717_s25 = smov 64   ;;  %s38_s21 = int_to_ptr.vmem [resolvable:$true] %s37_s21 }
   0x5   :  { %s718_s26 = smov 4   ;;  %s719_s27 = smov [#allocation2]  }
   0x6   :  { %43 = dma.hbm_to_vmem [thread:$0]  %s36_s19, 1024, %s38_s21, [#allocation6], %s717_s25, %s717_s25, %s718_s26  }
   0x7   :  { %s27_s28 = sshll.u32 %s719_s27, 4  ;;  %s54_s12 = sshll.u32 %s824_s5, 4  ;;  %s28_s28 = int_to_ptr.vmem [resolvable:$true] %s27_s28  ;;  %s55_s12 = int_to_ptr.hbm [resolvable:$true] %s54_s12 }
   0x8   :  { %30 = dma.hbm_to_vmem [thread:$0]  %s26_s24, 64, %s28_s28, [#allocation3]  }
   0x9   :  { %s73_s14 = sshll.u32 %s828_s9, 4  ;;  %s720_s15 = smov [#allocation7]   ;;  %s74_s14 = int_to_ptr.hbm [resolvable:$true] %s73_s14 }
   0xa   :  { %s56_s16 = sshll.u32 %s720_s15, 4  ;;  %s721_s0 = smov [#allocation8]   ;;  %s57_s16 = int_to_ptr.vmem [resolvable:$true] %s56_s16 }
   0xb   :  { %62 = dma.hbm_to_vmem [thread:$0]  %s55_s12, 1024, %s57_s16, [#allocation6], %s717_s25, %s717_s25, %s718_s26  }
   0xc   :  { %s75_s17 = sshll.u32 %s721_s0, 4  ;;  %s76_s17 = int_to_ptr.vmem [resolvable:$true] %s75_s17 }
   0xd   :  { %81 = dma.hbm_to_vmem [thread:$0]  %s74_s14, 1024, %s76_s17, [#allocation9], %s717_s25, %s717_s25, %s718_s26  }
   0xe   :  { %708 = dma.done.wait [#allocation3], 64  }
   0xf   :  { %709 = vsyncadd [#allocation3], 4294967232 }
  0x10   :  { %710 = dma.done.wait [#allocation6], 2048  }
  0x11   :  { %711 = vsyncadd [#allocation6], 4294965248 }
  0x12   :  { %712 = dma.done.wait [#allocation9], 1024  }
  0x13   :  { %713 = vsyncadd [#allocation9], 4294966272  ;;  %v553_v0 = vld [vmem:[#allocation5 + $0x38] sm:$0xff]  ;;  %v552_v1 = vld [vmem:[#allocation5 + $0x30] sm:$0xff]  ;;  %s722_s26 = smov [#allocation10]  }
  0x14   :  { %175 = vmatpush.bf16.msra.mxu0 %v553_v0  ;;  %v551_v2 = vld [vmem:[#allocation5 + $0x28] sm:$0xff]  ;;  %v550_v3 = vld [vmem:[#allocation5 + $0x20] sm:$0xff]  ;;  %v549_v4 = vld [vmem:[#allocation5 + $0x18] sm:$0xff]  ;;  %s436_s27 = sshll.u32 %s722_s26, 4  ;;  %s437_s27 = int_to_ptr.vmem [resolvable:$true] %s436_s27 }
  0x15   :  { %v548_v5 = vld [vmem:[#allocation5 + $0x10] sm:$0xff]  ;;  %v547_v6 = vld [vmem:[#allocation5 + $0x8] sm:$0xff]  ;;  %v546_v7 = vld [vmem:[#allocation5] sm:$0xff] }
  0x16   :  { %v107_v8 = vld [vmem:[#allocation2] sm:$0xf]  ;;  %v560_v10 = vld [vmem:[#allocation7 + $0x30] sm:$0xff]  ;;  %v559_v11 = vld [vmem:[#allocation7 + $0x28] sm:$0xff] }
  0x17   :  { %v561_v9 = vld [vmem:[#allocation7 + $0x38] sm:$0xff]  ;;  %v558_v12 = vld [vmem:[#allocation7 + $0x20] sm:$0xff]  ;;  %v556_v19 = vld [vmem:[#allocation7 + $0x10] sm:$0xff] }
  0x18   :  { %176 = vmatpush.bf16.msra.mxu0 %v552_v1  ;;  %296 = vmatpush.bf16.msra.mxu1 %v561_v9  ;;  %v577_v13 = vld [vmem:[%s821_s2] ss:$0 sm:$0xff]  ;;  %v555_v24 = vld [vmem:[#allocation7 + $0x8] sm:$0xff]  ;;  %v554_v30 = vld [vmem:[#allocation7] sm:$0xff] }
  0x19   :  { %v557_v14 = vld [vmem:[#allocation7 + $0x18] sm:$0xff]  ;;  %v568_v56 = vld [vmem:[#allocation8 + $0x30] sm:$0xff]  ;;  %v567_v57 = vld [vmem:[#allocation8 + $0x28] sm:$0xff] }
  0x1a   :  { %v578_v47 = vld [vmem:[%s822_s3] ss:$0 sm:$0xff]  ;;  %v566_v58 = vld [vmem:[#allocation8 + $0x20] sm:$0xff]  ;;  %v564_v1 = vld [vmem:[#allocation8 + $0x10] sm:$0xff] }
  0x1b   :  { %v579_v50 = vld [vmem:[%s823_s4] ss:$0 sm:$0xff] }
  0x1c   :  { %177 = vmatpush.bf16.msra.mxu0 %v551_v2  ;;  %297 = vmatpush.bf16.msra.mxu1 %v560_v10  ;;  %v569_v55 = vld [vmem:[#allocation8 + $0x38] sm:$0xff] }
  0x1d   :  { %417 = vmatpush.bf16.msra.mxu2 %v569_v55  ;;  %v580_v59 = vld [vmem:[%s825_s6] ss:$0 sm:$0xff] }
  0x1e   :  { %v565_v60 = vld [vmem:[#allocation8 + $0x18] sm:$0xff] }
  0x20   :  { %178 = vmatpush.bf16.msra.mxu0 %v550_v3  ;;  %298 = vmatpush.bf16.msra.mxu1 %v559_v11 }
  0x21   :  { %418 = vmatpush.bf16.msra.mxu2 %v568_v56 }
  0x24   :  { %179 = vmatpush.bf16.msra.mxu0 %v549_v4  ;;  %299 = vmatpush.bf16.msra.mxu1 %v558_v12  ;;  %v562_v12 = vld [vmem:[#allocation8] sm:$0xff] }
  0x25   :  { %419 = vmatpush.bf16.msra.mxu2 %v567_v57 }
  0x28   :  { %180 = vmatpush.bf16.msra.mxu0 %v548_v5  ;;  %300 = vmatpush.bf16.msra.mxu1 %v557_v14 }
  0x29   :  { %420 = vmatpush.bf16.msra.mxu2 %v566_v58 }
  0x2c   :  { %181 = vmatpush.bf16.msra.mxu0 %v547_v6  ;;  %301 = vmatpush.bf16.msra.mxu1 %v556_v19  ;;  %v563_v6 = vld [vmem:[#allocation8 + $0x8] sm:$0xff] }
  0x2d   :  { %421 = vmatpush.bf16.msra.mxu2 %v565_v60 }
  0x30   :  { %182 = vmatpush.bf16.msra.mxu0 %v546_v7  ;;  %302 = vmatpush.bf16.msra.mxu1 %v555_v24 }
  0x31   :  { %422 = vmatpush.bf16.msra.mxu2 %v564_v1 }
  0x33   :  { %183 = vmatmul.bf16.vlgmr.msra.gmra.mxu0 %v107_v8 }
  0x34   :  { %303 = vmatpush.bf16.msra.mxu1 %v554_v30 }
  0x35   :  { %423 = vmatpush.bf16.msra.mxu2 %v563_v6 }
  0x39   :  { %424 = vmatpush.bf16.msra.mxu2 %v562_v12 }
  0xb0   :  { %v184_v15 = vpop.f32.mrf.mxu0 }
  0xb1   :  { %v185_v16 = vadd.f32 %v577_v13, %v184_v15 }
  0xb3   :  { %v188_v17 = vrot.slane %v185_v16, 4  ;;  %v194_v18 = vmul.f32 %v185_v16, %v185_v16 }
  0xb5   :  { %v189_v20 = vadd.f32 %v188_v17, %v185_v16  ;;  %v195_v21 = vrot.slane %v194_v18, 4 }
  0xb7   :  { %v190_v22 = vrot.slane %v189_v20, 2  ;;  %v196_v23 = vadd.f32 %v195_v21, %v194_v18 }
  0xb8   :  { %v186_v25 = vpop.f32.mrf.mxu0 }
  0xb9   :  { %v191_v26 = vadd.f32 %v190_v22, %v189_v20  ;;  %v197_v27 = vrot.slane %v196_v23, 2 }
  0xbb   :  { %v192_v28 = vrot.slane %v191_v26, 1  ;;  %v198_v29 = vadd.f32 %v197_v27, %v196_v23 }
  0xbd   :  { %v199_v31 = vrot.slane %v198_v29, 1  ;;  %v193_v32 = vadd.f32 %v192_v28, %v191_v26 }
  0xbf   :  { %v200_v33 = vadd.f32 %v199_v31, %v198_v29  ;;  %v201_v34 = vmul.f32 0.125, %v193_v32  ;;  %v581_v29 = vld [vmem:[%s826_s7] ss:$0 sm:$0xff]  ;;  %s438_s7 = sshll.u32 %s830_s11, 4  ;;  %s439_s7 = int_to_ptr.hbm [resolvable:$true] %s438_s7 }
  0xc0   :  { %v582_v32 = vld [vmem:[%s827_s8] ss:$0 sm:$0xff] }
  0xc1   :  { %v202_v35 = vmul.f32 0.125, %v200_v33  ;;  %v203_v36 = vmul.f32 %v201_v34, %v201_v34  ;;  %v206_v46 = vsub.f32 %v185_v16, %v201_v34 }
  0xc3   :  { %v204_v37 = vsub.f32 %v202_v35, %v203_v36 }
  0xc5   :  { %v205_v38 = vmax.f32 %v204_v37, 0.0  ;;  %v583_v37 = vld [vmem:[%s829_s10] ss:$0 sm:$0xff] }
  0xc7   :  { %v207_v39 = vadd.f32 1e-05, %v205_v38 }
  0xc9   :  { %584 = vrsqrt.f32 %v207_v39  ;;  %vm214_vm1 = vweird.f32 %v207_v39 }
  0xcf   :  { %v585_v40 = vpop.eup %584 }
  0xd0   :  { %v209_v41 = vmul.f32 %v585_v40, %v207_v39  ;;  %vm215_vm0 = vweird.f32 %v585_v40 }
  0xd1   :  { %vm216_vm2 = vmor %vm214_vm1, %vm215_vm0 }
  0xd2   :  { %v210_v42 = vmul.f32 %v585_v40, %v209_v41 }
  0xd4   :  { %v211_v43 = vmul.f32 0.5, %v210_v42 }
  0xd6   :  { %v212_v44 = vsub.f32 1.5, %v211_v43 }
  0xd8   :  { %v213_v45 = vmul.f32 %v585_v40, %v212_v44 }
  0xda   :  { %v217_v48 = vsel %vm216_vm2, %v585_v40, %v213_v45 }
  0xdb   :  { %v218_v49 = vmul.f32 %v217_v48, %v206_v46 }
  0xdd   :  { %v222_v51 = vmul.f32 %v578_v47, %v218_v49 }
  0xdf   :  { %v226_v52 = vadd.f32 %v579_v50, %v222_v51 }
  0xe1   :  { %v227_v53 = vmax.f32 %v226_v52, 0.0 }
  0xe3   :  { %v228_v54 = vpack.c.bf16 %v227_v53, %v227_v53 }
  0xe5   :  { %304 = vmatmul.bf16.vlgmr.msra.gmra.mxu1 %v228_v54 }
 0x162   :  { %v305_v61 = vpop.f32.mrf.mxu1 }
 0x163   :  { %v306_v62 = vadd.f32 %v580_v59, %v305_v61 }
 0x165   :  { %v309_v63 = vrot.slane %v306_v62, 4  ;;  %v315_v0 = vmul.f32 %v306_v62, %v306_v62 }
 0x167   :  { %v310_v2 = vadd.f32 %v309_v63, %v306_v62  ;;  %v316_v3 = vrot.slane %v315_v0, 4 }
 0x169   :  { %v311_v4 = vrot.slane %v310_v2, 2  ;;  %v317_v5 = vadd.f32 %v316_v3, %v315_v0 }
 0x16a   :  { %v307_v7 = vpop.f32.mrf.mxu1 }
 0x16b   :  { %v312_v8 = vadd.f32 %v311_v4, %v310_v2  ;;  %v318_v9 = vrot.slane %v317_v5, 2 }
 0x16d   :  { %v313_v10 = vrot.slane %v312_v8, 1  ;;  %v319_v11 = vadd.f32 %v318_v9, %v317_v5 }
 0x16f   :  { %v320_v13 = vrot.slane %v319_v11, 1  ;;  %v314_v14 = vadd.f32 %v313_v10, %v312_v8 }
 0x171   :  { %v321_v15 = vadd.f32 %v320_v13, %v319_v11  ;;  %v322_v16 = vmul.f32 0.125, %v314_v14 }
 0x173   :  { %v323_v17 = vmul.f32 0.125, %v321_v15  ;;  %v324_v18 = vmul.f32 %v322_v16, %v322_v16  ;;  %v327_v28 = vsub.f32 %v306_v62, %v322_v16 }
 0x175   :  { %v325_v19 = vsub.f32 %v323_v17, %v324_v18 }
 0x177   :  { %v326_v20 = vmax.f32 %v325_v19, 0.0 }
 0x179   :  { %v328_v21 = vadd.f32 1e-05, %v326_v20 }
 0x17b   :  { %586 = vrsqrt.f32 %v328_v21  ;;  %vm335_vm4 = vweird.f32 %v328_v21 }
 0x181   :  { %v587_v22 = vpop.eup %586 }
 0x182   :  { %v330_v23 = vmul.f32 %v587_v22, %v328_v21  ;;  %vm336_vm3 = vweird.f32 %v587_v22 }
 0x183   :  { %vm337_vm5 = vmor %vm335_vm4, %vm336_vm3 }
 0x184   :  { %v331_v24 = vmul.f32 %v587_v22, %v330_v23 }
 0x186   :  { %v332_v25 = vmul.f32 0.5, %v331_v24 }
 0x188   :  { %v333_v26 = vsub.f32 1.5, %v332_v25 }
 0x18a   :  { %v334_v27 = vmul.f32 %v587_v22, %v333_v26 }
 0x18c   :  { %v338_v30 = vsel %vm337_vm5, %v587_v22, %v334_v27 }
 0x18d   :  { %v339_v31 = vmul.f32 %v338_v30, %v327_v28 }
 0x18f   :  { %v343_v33 = vmul.f32 %v581_v29, %v339_v31 }
 0x191   :  { %v347_v34 = vadd.f32 %v582_v32, %v343_v33 }
 0x193   :  { %v348_v35 = vmax.f32 %v347_v34, 0.0 }
 0x195   :  { %v349_v36 = vpack.c.bf16 %v348_v35, %v348_v35 }
 0x197   :  { %425 = vmatmul.bf16.vlgmr.msra.gmra.mxu2 %v349_v36 }
 0x21a   :  { %v426_v38 = vpop.f32.mrf.mxu2 }
 0x21b   :  { %v427_v39 = vadd.f32 %v583_v37, %v426_v38 }
 0x21d   :  { %430 = vst [vmem:[#allocation10] sm:$0xff] %v427_v39 }
 0x21e   :  { %441 = dma.vmem_to_hbm [thread:$0]  %s437_s27, 128, %s439_s7, [#allocation4]  }
 0x222   :  { %v428_v40 = vpop.f32.mrf.mxu2 }
 0x223   :  { %714 = dma.done.wait [#allocation4], 128  }
 0x224   :  { %715 = vsyncadd [#allocation4], 4294967168 }
 0x225   :  { %446 = vsyncpa [#allocation3], 1 }
 0x226   :  { %447 = vsyncpa [#allocation6], 1 }
 0x227   :  { %448 = vsyncpa [#allocation9], 1 }
 0x228   :  { %449 = vsyncpa [#allocation4], 1 }

</bundles_post_ra>
